<compile_context>
chip_gen: v7x
topology: tpu7x:2x2x1
jax: 0.10.0
libtpu: 0.0.40
codegen_flags: <defaults>
</compile_context>

<pallas_src>
import math

import jax
import jax.numpy as jnp
from jax.experimental import pallas as pl
from jax.experimental.pallas import tpu as pltpu

LN_EPS = 1e-5   # torch.nn.LayerNorm default
GROUPS = 8      # groups of the 1x1 convs in the PyTorch module


def _layernorm_f32(x, gamma, beta):
    """LayerNorm over the last axis, all math in f32 (v5e-safe)."""
    x = x.astype(jnp.float32)
    mu = jnp.mean(x, axis=-1, keepdims=True)
    var = jnp.mean((x - mu) ** 2, axis=-1, keepdims=True)
    return (x - mu) * jax.lax.rsqrt(var + LN_EPS) * gamma + beta


def token_learner_kernel(x_ref, g1_ref, b1_ref, w1t_ref, w2t_ref, wft_ref,
                         g2_ref, b2_ref, sel_ref, out_ref):
    m, c = x_ref.shape          # m = bt * N rows, c = channels (static)
    bt, s, n = sel_ref.shape    # batch block, out_token, tokens (static)

    # ---- whole-block work: one (bt*N, C) slab ------------------------------
    xn = _layernorm_f32(x_ref[...], g1_ref[...], b1_ref[...])       # (M, C) f32
    xn_bf = xn.astype(jnp.bfloat16)

    # grouped 1x1 convs as block-diagonal dense matmuls (pre-transposed bf16
    # weights; f32 accumulation on the MXU), M = bt*N rows each.
    h = jnp.dot(xn_bf, w1t_ref[...],
                preferred_element_type=jnp.float32).astype(jnp.bfloat16)   # (M, C)
    feat = jnp.dot(xn_bf, wft_ref[...],
                   preferred_element_type=jnp.float32).astype(jnp.bfloat16)  # (M, C)

    # token logits for the whole block: one big (M, C) x (C, S) matmul.
    logits = jnp.dot(h, w2t_ref[...], preferred_element_type=jnp.float32)    # (M, S)

    # bring tokens onto the lane axis (one minor-dim transpose per batch tile,
    # XLU slot, off the VALU/MXU critical path) and softmax over N once.
    logits_t = jnp.swapaxes(logits.reshape(bt, n, s), 1, 2)                  # (bt, S, N)
    mx = jnp.max(logits_t, axis=-1, keepdims=True)
    e = jnp.exp(logits_t - mx)
    denom = jnp.sum(e, axis=-1, keepdims=True)
    sel_t = e / denom                                                        # exact softmax, f32
    sel_ref[...] = sel_t.astype(sel_ref.dtype)

    # token mixing for the whole block: batched matmul (bt, S, N) x (bt, N, C).
    feat3 = feat.reshape(bt, n, c)
    out3 = jnp.einsum('bsn,bnc->bsc', sel_t.astype(jnp.bfloat16), feat3,
                      preferred_element_type=jnp.float32)                    # (bt, S, C)

    # final LayerNorm applied once to the whole block (single gamma/beta
    # broadcast, one fused reduction pass).
    out_ref[...] = _layernorm_f32(out3, g2_ref[...], b2_ref[...]).astype(out_ref.dtype)


def _block_diag_from_grouped(w, groups):
    """Grouped 1x1-conv weight (C_out, C_in/groups) -> dense (C_out, C_in)."""
    c_out, _ = w.shape
    gs = c_out // groups
    dense = jnp.zeros((c_out, c_out), w.dtype)
    for g in range(groups):
        dense = dense.at[g * gs:(g + 1) * gs, g * gs:(g + 1) * gs].set(
            w[g * gs:(g + 1) * gs, :])
    return dense


def prepare_params(params, groups=GROUPS):
    """One-time host-side weight prep (outside the jitted forward): block-diag
    expansion of the grouped convs, pre-transposition so the kernel never
    transposes weights, bf16 cast of all matmul weights (LN params stay f32)."""
    C = params["g1"].shape[0]
    return {
        "g1": params["g1"].reshape(1, C).astype(jnp.float32),
        "b1": params["b1"].reshape(1, C).astype(jnp.float32),
        "w1t": _block_diag_from_grouped(params["w1"], groups).T.astype(jnp.bfloat16),
        "w2t": params["w2"].T.astype(jnp.bfloat16),                 # (C, S)
        "wft": _block_diag_from_grouped(params["wf"], groups).T.astype(jnp.bfloat16),
        "g2": params["g2"].reshape(1, C).astype(jnp.float32),
        "b2": params["b2"].reshape(1, C).astype(jnp.float32),
    }


def _ceil_to(x, m):
    return -(-x // m) * m


def _vmem_bytes_per_step(bt, n, c, s):
    """Conservative per-grid-step VMEM estimate incl. (8,128) tile padding."""
    cp, sp, npad = _ceil_to(c, 128), _ceil_to(s, 128), _ceil_to(n, 128)
    m8 = _ceil_to(bt * n, 8)
    s8, n8 = _ceil_to(s, 8), _ceil_to(n, 8)
    io = (2 * m8 * cp * 4                    # x block, double-buffered
          + 2 * bt * s8 * npad * 4           # sel block, double-buffered
          + 2 * bt * s8 * cp * 4)            # out block, double-buffered
    w = 2 * (2 * cp * cp * 2 + cp * sp * 2 + 4 * cp * 4)   # const weights
    tmp = (m8 * cp * 10 + m8 * sp * 4
           + bt * n8 * sp * 8 + bt * s8 * npad * 8 + bt * s8 * cp * 8)
    return io + w + tmp


def _vmem_budget_bytes():
    """Generation-aware scoped-VMEM budget: v5e/v6e have 128 MiB physical
    (use 64 MiB), v7x-class only 64 MiB (stay at 32 MiB)."""
    try:
        cap = int(pltpu.get_tpu_info().vmem_capacity_bytes)
    except Exception:
        cap = 64 * 1024 * 1024
    if cap >= 128 * 1024 * 1024:
        return 64 * 1024 * 1024
    return 32 * 1024 * 1024


def _pick_batch_block(B, N, C, S, vmem_budget):
    """Batch elements per grid step: target ~512 MXU rows, fit the VMEM budget,
    keep >=2 (even) grid steps when the batch allows (v7x shards the 'parallel'
    axis over 2 TensorCores), and keep bt*N a multiple of 8 (sublane-aligned
    input blocks)."""
    bt = max(1, -(-512 // N))
    bt = min(bt, B)
    while bt > 1 and _vmem_bytes_per_step(bt, N, C, S) > vmem_budget // 2:
        bt = max(1, bt // 2)
    if B >= 2:
        bt = min(bt, -(-B // 2))             # at least two grid steps
        nsteps = -(-B // bt)
        if nsteps > 1 and nsteps % 2 == 1:
            bt = -(-B // (nsteps + 1))       # even step count for 2-TC sharding
    mult = 8 // math.gcd(N, 8)
    return max(mult, -(-bt // mult) * mult)


@jax.jit
def token_learner(x, p):
    """x: (B, N, C) float32; p: prepare_params(...) output.
    Returns (selected (B, S, N), out (B, S, C)) like the PyTorch module."""
    B, N, C = x.shape
    S = p["w2t"].shape[1]

    vmem_budget = _vmem_budget_bytes()
    bt = _pick_batch_block(B, N, C, S, vmem_budget)
    pad = (-B) % bt
    xb = jnp.pad(x, ((0, pad), (0, 0), (0, 0))) if pad else x
    Bp = B + pad
    x2d = xb.reshape(Bp * N, C)     # contiguous flatten: metadata-only on host

    flops = 2 * Bp * N * C * (2 * C + S) + 2 * Bp * S * N * C
    bytes_accessed = int(
        x2d.size * x2d.dtype.itemsize
        + sum(v.size * v.dtype.itemsize for v in p.values())
        + Bp * S * N * x.dtype.itemsize + Bp * S * C * x.dtype.itemsize)
    cost = pl.CostEstimate(flops=flops, transcendentals=Bp * S * N,
                           bytes_accessed=bytes_accessed)

    const2d = lambda shape: pl.BlockSpec(shape, lambda i: (0, 0))

    sel, out = pl.pallas_call(
        token_learner_kernel,
        out_shape=(
            jax.ShapeDtypeStruct((Bp, S, N), x.dtype),
            jax.ShapeDtypeStruct((Bp, S, C), x.dtype),
        ),
        grid_spec=pltpu.PrefetchScalarGridSpec(
            num_scalar_prefetch=0,
            grid=(Bp // bt,),
            in_specs=[
                pl.BlockSpec((bt * N, C), lambda i: (i, 0)),  # x slab (2D, dense)
                const2d((1, C)),   # token_norm gamma
                const2d((1, C)),   # token_norm beta
                const2d((C, C)),   # tokenLearner conv1 (block-diag, transposed, bf16)
                const2d((C, S)),   # tokenLearner conv2 (transposed, bf16)
                const2d((C, C)),   # feat conv (block-diag, transposed, bf16)
                const2d((1, C)),   # norm gamma
                const2d((1, C)),   # norm beta
            ],
            out_specs=[
                pl.BlockSpec((bt, S, N), lambda i: (i, 0, 0)),
                pl.BlockSpec((bt, S, C), lambda i: (i, 0, 0)),
            ],
        ),
        compiler_params=pltpu.CompilerParams(
            dimension_semantics=("parallel",),
            vmem_limit_bytes=vmem_budget),
        cost_estimate=cost,
    )(x2d, p["g1"], p["b1"], p["w1t"], p["w2t"], p["wft"], p["g2"], p["b2"])

    if pad:
        sel, out = sel[:B], out[:B]
    return sel, out


def token_learner_ref(x, params, groups=GROUPS):
    """Pure-JAX f32 reference mirroring the PyTorch forward (for testing)."""
    def ln(v, g, b):
        mu = v.mean(-1, keepdims=True)
        var = ((v - mu) ** 2).mean(-1, keepdims=True)
        return (v - mu) / jnp.sqrt(var + LN_EPS) * g + b

    xn = ln(x, params["g1"], params["b1"])                      # (B, N, C)
    w1d = _block_diag_from_grouped(params["w1"], groups)        # (C, C)
    wfd = _block_diag_from_grouped(params["wf"], groups)
    h = jnp.einsum('bnc,dc->bnd', xn, w1d)
    logits = jnp.einsum('bnd,sd->bsn', h, params["w2"])         # (B, S, N)
    sel = jax.nn.softmax(logits, axis=-1)
    feat = jnp.einsum('bnc,dc->bnd', xn, wfd)                   # (B, N, C)
    out = jnp.einsum('bsn,bnd->bsd', sel, feat)
    return sel, ln(out, params["g2"], params["b2"])


def init_params(key, input_embed_dim, out_token=30, groups=GROUPS):
    C = input_embed_dim
    k1, k2, k3 = jax.random.split(key, 3)
    s_g = (C // groups) ** -0.5      # ~ torch kaiming fan_in scale for grouped conv
    s_d = C ** -0.5
    return {
        "g1": jnp.ones((C,), jnp.float32),
        "b1": jnp.zeros((C,), jnp.float32),
        "w1": jax.random.normal(k1, (C, C // groups), jnp.float32) * s_g,
        "w2": jax.random.normal(k2, (out_token, C), jnp.float32) * s_d,
        "wf": jax.random.normal(k3, (C, C // groups), jnp.float32) * s_g,
        "g2": jnp.ones((C,), jnp.float32),
        "b2": jnp.zeros((C,), jnp.float32),
    }


if __name__ == "__main__":
    B, N, C, S = 4, 16, 32, 30   # batch, tokens (H*W of the 1x1-conv view), embed dim, out_token

    key = jax.random.PRNGKey(0)
    kx, kp = jax.random.split(key)
    x = jax.random.normal(kx, (B, N, C), jnp.float32)
    raw_params = init_params(kp, input_embed_dim=C, out_token=S, groups=GROUPS)
    params = prepare_params(raw_params, groups=GROUPS)

    selected, out = token_learner(x, params)
    jax.block_until_ready((selected, out))

    assert selected.shape == (B, S, N)
    assert out.shape == (B, S, C)
    assert bool(jnp.all(jnp.isfinite(selected))) and bool(jnp.all(jnp.isfinite(out)))
    # softmax rows of `selected` sum to 1 over N (exact division in the kernel)
    assert jnp.allclose(jnp.sum(selected, axis=-1), 1.0, atol=1e-3)

    # pure-JAX f32 reference; kernel uses bf16 matmuls, so tolerances are loose.
    sel_ref, out_ref = token_learner_ref(x, raw_params, groups=GROUPS)
    assert jnp.allclose(selected, sel_ref, atol=3e-2), "selected mismatch vs reference"
    assert jnp.allclose(out, out_ref, atol=1e-1, rtol=1e-1), "out mismatch vs reference"

    print("KERNEL_OK")
</pallas_src>

<mosaic_0001>
module attributes {stable_mosaic.version = 11 : i64} {
  func.func @token_learner_kernel(%arg0: i32, %arg1: memref<32x32xf32, #tpu.memory_space<vmem>>, %arg2: memref<1x32xf32, #tpu.memory_space<vmem>>, %arg3: memref<1x32xf32, #tpu.memory_space<vmem>>, %arg4: memref<32x32xbf16, #tpu.memory_space<vmem>>, %arg5: memref<32x30xbf16, #tpu.memory_space<vmem>>, %arg6: memref<32x32xbf16, #tpu.memory_space<vmem>>, %arg7: memref<1x32xf32, #tpu.memory_space<vmem>>, %arg8: memref<1x32xf32, #tpu.memory_space<vmem>>, %arg9: memref<2x30x16xf32, #tpu.memory_space<vmem>>, %arg10: memref<2x30x32xf32, #tpu.memory_space<vmem>>) attributes {dimension_semantics = [#tpu.dimension_semantics<parallel>], iteration_bounds = array<i64: 2>, scalar_prefetch = 0 : i64, scratch_operands = 0 : i64, tpu.core_type = #tpu.core_type<tc>, window_params = [{transform_indices = @transform_0, window_bounds = array<i64: 32, 32>}, {pipeline_mode = #tpu.pipeline_mode<synchronous>, transform_indices = @transform_1, window_bounds = array<i64: 1, 32>}, {pipeline_mode = #tpu.pipeline_mode<synchronous>, transform_indices = @transform_2, window_bounds = array<i64: 1, 32>}, {pipeline_mode = #tpu.pipeline_mode<synchronous>, transform_indices = @transform_3, window_bounds = array<i64: 32, 32>}, {pipeline_mode = #tpu.pipeline_mode<synchronous>, transform_indices = @transform_4, window_bounds = array<i64: 32, 30>}, {pipeline_mode = #tpu.pipeline_mode<synchronous>, transform_indices = @transform_5, window_bounds = array<i64: 32, 32>}, {pipeline_mode = #tpu.pipeline_mode<synchronous>, transform_indices = @transform_6, window_bounds = array<i64: 1, 32>}, {pipeline_mode = #tpu.pipeline_mode<synchronous>, transform_indices = @transform_7, window_bounds = array<i64: 1, 32>}, {transform_indices = @transform_8, window_bounds = array<i64: 2, 30, 16>}, {transform_indices = @transform_9, window_bounds = array<i64: 2, 30, 32>}]} {
    %c0 = arith.constant 0 : index
    %c0_0 = arith.constant 0 : index
    %0 = vector.load %arg1[%c0, %c0_0] : memref<32x32xf32, #tpu.memory_space<vmem>>, vector<32x32xf32>
    %c0_1 = arith.constant 0 : index
    %c0_2 = arith.constant 0 : index
    %1 = vector.load %arg2[%c0_1, %c0_2] : memref<1x32xf32, #tpu.memory_space<vmem>>, vector<1x32xf32>
    %c0_3 = arith.constant 0 : index
    %c0_4 = arith.constant 0 : index
    %2 = vector.load %arg3[%c0_3, %c0_4] : memref<1x32xf32, #tpu.memory_space<vmem>>, vector<1x32xf32>
    %cst = arith.constant dense<0.000000e+00> : vector<32xf32>
    %3 = vector.multi_reduction <add>, %0, %cst [1] : vector<32x32xf32> to vector<32xf32>
    %4 = vector.shape_cast %3 : vector<32xf32> to vector<32x1xf32>
    %cst_5 = arith.constant 3.200000e+01 : f32
    %5 = vector.broadcast %cst_5 : f32 to vector<32x1xf32>
    %6 = arith.divf %4, %5 : vector<32x1xf32>
    %7 = vector.broadcast %6 : vector<32x1xf32> to vector<32x32xf32>
    %8 = arith.subf %0, %7 : vector<32x32xf32>
    %9 = arith.mulf %8, %8 : vector<32x32xf32>
    %cst_6 = arith.constant dense<0.000000e+00> : vector<32xf32>
    %10 = vector.multi_reduction <add>, %9, %cst_6 [1] : vector<32x32xf32> to vector<32xf32>
    %11 = vector.shape_cast %10 : vector<32xf32> to vector<32x1xf32>
    %cst_7 = arith.constant 3.200000e+01 : f32
    %12 = vector.broadcast %cst_7 : f32 to vector<32x1xf32>
    %13 = arith.divf %11, %12 : vector<32x1xf32>
    %14 = vector.broadcast %6 : vector<32x1xf32> to vector<32x32xf32>
    %15 = arith.subf %0, %14 : vector<32x32xf32>
    %cst_8 = arith.constant 9.99999974E-6 : f32
    %16 = vector.broadcast %cst_8 : f32 to vector<32x1xf32>
    %17 = arith.addf %13, %16 : vector<32x1xf32>
    %18 = math.rsqrt %17 : vector<32x1xf32>
    %19 = vector.broadcast %18 : vector<32x1xf32> to vector<32x32xf32>
    %20 = arith.mulf %15, %19 : vector<32x32xf32>
    %21 = vector.broadcast %1 : vector<1x32xf32> to vector<32x32xf32>
    %22 = arith.mulf %20, %21 : vector<32x32xf32>
    %23 = vector.broadcast %2 : vector<1x32xf32> to vector<32x32xf32>
    %24 = arith.addf %22, %23 : vector<32x32xf32>
    %25 = arith.truncf %24 : vector<32x32xf32> to vector<32x32xbf16>
    %c0_9 = arith.constant 0 : index
    %c0_10 = arith.constant 0 : index
    %26 = vector.load %arg4[%c0_9, %c0_10] : memref<32x32xbf16, #tpu.memory_space<vmem>>, vector<32x32xbf16>
    %cst_11 = arith.constant dense<0.000000e+00> : vector<32x32xf32>
    %27 = tpu.matmul %25, %26, %cst_11 {dimension_numbers = #tpu.dot_dimension_numbers<[1], [0], [0], [1], [0, 0, 1, 1], [], []>} : vector<32x32xbf16>, vector<32x32xbf16>, vector<32x32xf32> -> vector<32x32xf32>
    %28 = arith.truncf %27 : vector<32x32xf32> to vector<32x32xbf16>
    %c0_12 = arith.constant 0 : index
    %c0_13 = arith.constant 0 : index
    %29 = vector.load %arg6[%c0_12, %c0_13] : memref<32x32xbf16, #tpu.memory_space<vmem>>, vector<32x32xbf16>
    %cst_14 = arith.constant dense<0.000000e+00> : vector<32x32xf32>
    %30 = tpu.matmul %25, %29, %cst_14 {dimension_numbers = #tpu.dot_dimension_numbers<[1], [0], [0], [1], [0, 0, 1, 1], [], []>} : vector<32x32xbf16>, vector<32x32xbf16>, vector<32x32xf32> -> vector<32x32xf32>
    %31 = arith.truncf %30 : vector<32x32xf32> to vector<32x32xbf16>
    %c0_15 = arith.constant 0 : index
    %c0_16 = arith.constant 0 : index
    %32 = vector.load %arg5[%c0_15, %c0_16] : memref<32x30xbf16, #tpu.memory_space<vmem>>, vector<32x30xbf16>
    %cst_17 = arith.constant dense<0.000000e+00> : vector<32x30xf32>
    %33 = tpu.matmul %28, %32, %cst_17 {dimension_numbers = #tpu.dot_dimension_numbers<[1], [0], [0], [1], [0, 0, 1, 1], [], []>} : vector<32x32xbf16>, vector<32x30xbf16>, vector<32x30xf32> -> vector<32x30xf32>
    %34 = vector.shape_cast %33 : vector<32x30xf32> to vector<2x16x30xf32>
    %35 = tpu.transpose %34, [0, 2, 1] : vector<2x16x30xf32> -> vector<2x30x16xf32>
    %cst_18 = arith.constant dense<0xFF800000> : vector<2x30xf32>
    %36 = vector.multi_reduction <maximumf>, %35, %cst_18 [2] : vector<2x30x16xf32> to vector<2x30xf32>
    %37 = vector.shape_cast %36 : vector<2x30xf32> to vector<2x30x1xf32>
    %38 = vector.broadcast %37 : vector<2x30x1xf32> to vector<2x30x16xf32>
    %39 = arith.subf %35, %38 : vector<2x30x16xf32>
    %40 = math.exp %39 : vector<2x30x16xf32>
    %cst_19 = arith.constant dense<0.000000e+00> : vector<2x30xf32>
    %41 = vector.multi_reduction <add>, %40, %cst_19 [2] : vector<2x30x16xf32> to vector<2x30xf32>
    %42 = vector.shape_cast %41 : vector<2x30xf32> to vector<2x30x1xf32>
    %43 = vector.broadcast %42 : vector<2x30x1xf32> to vector<2x30x16xf32>
    %44 = arith.divf %40, %43 : vector<2x30x16xf32>
    %c0_20 = arith.constant 0 : index
    %c0_21 = arith.constant 0 : index
    %c0_22 = arith.constant 0 : index
    %45 = vector.load %arg9[%c0_20, %c0_21, %c0_22] : memref<2x30x16xf32, #tpu.memory_space<vmem>>, vector<2x30x16xf32>
    tpu.vector_store %arg9[%c0_20, %c0_21, %c0_22], %44 {strides = array<i32>} : memref<2x30x16xf32, #tpu.memory_space<vmem>>, vector<2x30x16xf32>,
    %46 = vector.shape_cast %31 : vector<32x32xbf16> to vector<2x16x32xbf16>
    %47 = arith.truncf %44 : vector<2x30x16xf32> to vector<2x30x16xbf16>
    "tpu.trace_start"() <{level = 10 : i32, message = "bsn,bnc->bsc"}> : () -> ()
    %cst_23 = arith.constant dense<0.000000e+00> : vector<2x30x32xf32>
    %48 = tpu.matmul %47, %46, %cst_23 {dimension_numbers = #tpu.dot_dimension_numbers<[2], [1], [1], [2], [0, 0, 0, 1, 1, 2], [0], [0]>} : vector<2x30x16xbf16>, vector<2x16x32xbf16>, vector<2x30x32xf32> -> vector<2x30x32xf32>
    "tpu.trace_stop"() : () -> ()
    %c0_24 = arith.constant 0 : index
    %c0_25 = arith.constant 0 : index
    %49 = vector.load %arg7[%c0_24, %c0_25] : memref<1x32xf32, #tpu.memory_space<vmem>>, vector<1x32xf32>
    %c0_26 = arith.constant 0 : index
    %c0_27 = arith.constant 0 : index
    %50 = vector.load %arg8[%c0_26, %c0_27] : memref<1x32xf32, #tpu.memory_space<vmem>>, vector<1x32xf32>
    %cst_28 = arith.constant dense<0.000000e+00> : vector<2x30xf32>
    %51 = vector.multi_reduction <add>, %48, %cst_28 [2] : vector<2x30x32xf32> to vector<2x30xf32>
    %52 = vector.shape_cast %51 : vector<2x30xf32> to vector<2x30x1xf32>
    %cst_29 = arith.constant 3.200000e+01 : f32
    %53 = vector.broadcast %cst_29 : f32 to vector<2x30x1xf32>
    %54 = arith.divf %52, %53 : vector<2x30x1xf32>
    %55 = vector.broadcast %54 : vector<2x30x1xf32> to vector<2x30x32xf32>
    %56 = arith.subf %48, %55 : vector<2x30x32xf32>
    %57 = arith.mulf %56, %56 : vector<2x30x32xf32>
    %cst_30 = arith.constant dense<0.000000e+00> : vector<2x30xf32>
    %58 = vector.multi_reduction <add>, %57, %cst_30 [2] : vector<2x30x32xf32> to vector<2x30xf32>
    %59 = vector.shape_cast %58 : vector<2x30xf32> to vector<2x30x1xf32>
    %cst_31 = arith.constant 3.200000e+01 : f32
    %60 = vector.broadcast %cst_31 : f32 to vector<2x30x1xf32>
    %61 = arith.divf %59, %60 : vector<2x30x1xf32>
    %62 = vector.broadcast %54 : vector<2x30x1xf32> to vector<2x30x32xf32>
    %63 = arith.subf %48, %62 : vector<2x30x32xf32>
    %cst_32 = arith.constant 9.99999974E-6 : f32
    %64 = vector.broadcast %cst_32 : f32 to vector<2x30x1xf32>
    %65 = arith.addf %61, %64 : vector<2x30x1xf32>
    %66 = math.rsqrt %65 : vector<2x30x1xf32>
    %67 = vector.broadcast %66 : vector<2x30x1xf32> to vector<2x30x32xf32>
    %68 = arith.mulf %63, %67 : vector<2x30x32xf32>
    %69 = vector.shape_cast %49 : vector<1x32xf32> to vector<1x1x32xf32>
    %70 = vector.broadcast %69 : vector<1x1x32xf32> to vector<2x30x32xf32>
    %71 = arith.mulf %68, %70 : vector<2x30x32xf32>
    %72 = vector.shape_cast %50 : vector<1x32xf32> to vector<1x1x32xf32>
    %73 = vector.broadcast %72 : vector<1x1x32xf32> to vector<2x30x32xf32>
    %74 = arith.addf %71, %73 : vector<2x30x32xf32>
    %c0_33 = arith.constant 0 : index
    %c0_34 = arith.constant 0 : index
    %c0_35 = arith.constant 0 : index
    %75 = vector.load %arg10[%c0_33, %c0_34, %c0_35] : memref<2x30x32xf32, #tpu.memory_space<vmem>>, vector<2x30x32xf32>
    tpu.vector_store %arg10[%c0_33, %c0_34, %c0_35], %74 {strides = array<i32>} : memref<2x30x32xf32, #tpu.memory_space<vmem>>, vector<2x30x32xf32>,
    return
  }
  func.func @transform_0(%arg0: i32) -> (i32, i32) {
    %c0_i32 = arith.constant 0 : i32
    %c0_i32_0 = arith.constant 0 : i32
    return %arg0, %c0_i32 : i32, i32
  }
  func.func @transform_1(%arg0: i32) -> (i32, i32) {
    %c0_i32 = arith.constant 0 : i32
    %c0_i32_0 = arith.constant 0 : i32
    %c0_i32_1 = arith.constant 0 : i32
    return %c0_i32, %c0_i32_0 : i32, i32
  }
  func.func @transform_2(%arg0: i32) -> (i32, i32) {
    %c0_i32 = arith.constant 0 : i32
    %c0_i32_0 = arith.constant 0 : i32
    %c0_i32_1 = arith.constant 0 : i32
    return %c0_i32, %c0_i32_0 : i32, i32
  }
  func.func @transform_3(%arg0: i32) -> (i32, i32) {
    %c0_i32 = arith.constant 0 : i32
    %c0_i32_0 = arith.constant 0 : i32
    %c0_i32_1 = arith.constant 0 : i32
    return %c0_i32, %c0_i32_0 : i32, i32
  }
  func.func @transform_4(%arg0: i32) -> (i32, i32) {
    %c0_i32 = arith.constant 0 : i32
    %c0_i32_0 = arith.constant 0 : i32
    %c0_i32_1 = arith.constant 0 : i32
    return %c0_i32, %c0_i32_0 : i32, i32
  }
  func.func @transform_5(%arg0: i32) -> (i32, i32) {
    %c0_i32 = arith.constant 0 : i32
    %c0_i32_0 = arith.constant 0 : i32
    %c0_i32_1 = arith.constant 0 : i32
    return %c0_i32, %c0_i32_0 : i32, i32
  }
  func.func @transform_6(%arg0: i32) -> (i32, i32) {
    %c0_i32 = arith.constant 0 : i32
    %c0_i32_0 = arith.constant 0 : i32
    %c0_i32_1 = arith.constant 0 : i32
    return %c0_i32, %c0_i32_0 : i32, i32
  }
  func.func @transform_7(%arg0: i32) -> (i32, i32) {
    %c0_i32 = arith.constant 0 : i32
    %c0_i32_0 = arith.constant 0 : i32
    %c0_i32_1 = arith.constant 0 : i32
    return %c0_i32, %c0_i32_0 : i32, i32
  }
  func.func @transform_8(%arg0: i32) -> (i32, i32, i32) {
    %c0_i32 = arith.constant 0 : i32
    %c0_i32_0 = arith.constant 0 : i32
    %c0_i32_1 = arith.constant 0 : i32
    return %arg0, %c0_i32, %c0_i32_0 : i32, i32, i32
  }
  func.func @transform_9(%arg0: i32) -> (i32, i32, i32) {
    %c0_i32 = arith.constant 0 : i32
    %c0_i32_0 = arith.constant 0 : i32
    %c0_i32_1 = arith.constant 0 : i32
    return %arg0, %c0_i32, %c0_i32_0 : i32, i32, i32
  }
}

</mosaic_0001>

<bundles_post_ra>
// kernel: token_learner.1
= control target key start
LH: loop header
LB: loop body
LE: loop exit
PB: predicated region body
PF: predicated region fallthrough
CT: control target
= control target key end

     0   :  { %15 = vsyncpa [#allocation3], 0  ;;  %s1969_s0 = inlined_call_operand.hbm [shape: f32[64,32], index: 0, kind: input, shape index: {}]   ;;  %s1970_s1 = inlined_call_operand.vmem [shape: f32[1,32], index: 1, kind: input, shape index: {}]   ;;  %s1971_s2 = inlined_call_operand.vmem [shape: f32[1,32], index: 2, kind: input, shape index: {}]   ;;  %s1972_s3 = inlined_call_operand.vmem [shape: bf16[32,32], index: 3, kind: input, shape index: {}]   ;;  %s1973_s4 = inlined_call_operand.hbm [shape: bf16[32,30], index: 4, kind: input, shape index: {}]   ;;  %s1974_s5 = inlined_call_operand.hbm [shape: bf16[32,32], index: 5, kind: input, shape index: {}]   ;;  %s1975_s6 = inlined_call_operand.vmem [shape: f32[1,32], index: 6, kind: input, shape index: {}]   ;;  %s1976_s7 = inlined_call_operand.vmem [shape: f32[1,32], index: 7, kind: input, shape index: {}]   ;;  %s1977_s8 = inlined_call_operand.vmem [shape: f32[4,30,16], index: 8, kind: output, shape index: {0}]   ;;  %s1978_s9 = inlined_call_operand.vmem [shape: f32[4,30,32], index: 9, kind: output, shape index: {1}]  }
   0x1   :  { %17 = vsyncpa [#allocation3 + $0x1], 0 }
   0x2   :  { %18 = vsyncpa [#allocation5], 0  ;;  %s1647_s30 = smov 0   ;;  %s1649_s10 = smov 0  }
   0x3   :  { %s1651_s11 = smov 0   ;;  %s1653_s12 = smov 0  }
   0x4 LB: > { %s1239_s13 = sadd.s32 4294967295, %s1588_s12   ;;  %p44_p0 = scmp.ne.s32.totalorder %s1580_s10, %s1576_s30  ;;  %s1588_s12 = sphi %s1653_s12, %s1994_s12   ;;  %s1584_s11 = sphi %s1651_s11, %s1993_s11   ;;  %s1580_s10 = sphi %s1649_s10, %s1992_s10   ;;  %s1576_s30 = sphi %s1647_s30, %s1991_s30  }
   0x5   : > { %p1669_p1 = scmp.eq.s32.totalorder %s1239_s13, 0  ;;  %p1241_p2 = scmp.ge.s32.totalorder %s1588_s12, 1 }
   0x6   : > { %p254_p3 = scmp.lt.s32.totalorder %s1588_s12, 3  ;;  %s1590_s17 = smov [#allocation4]  }
   0x7   : > { %s1983_s14 = scalar_select %p1669_p1, 1, 0 }
   0x8   : > { %p1677_p4 = por %p1669_p1, %p44_p0  ;;  %p1681_p5 = pnand %p1241_p2, %p254_p3 }
   0x9   : > { %s275_s18 = sshll.u32 %s1590_s17, 4  ;;  %s1591_s20 = smov [#allocation6]   ;;  %s276_s18 = int_to_ptr.vmem [resolvable:$true] %s275_s18 }
   0xa   : > { %s1984_s15 = scalar_select %p1677_p4, 1, 0 }
   0xb   : > { %s1985_s16 = scalar_select %p1681_p5, 1, 0 }
   0xc   : > { %p1347_p6 = pneg %p1681_p5  ;;  %s288_s21 = sshll.u32 %s1591_s20, 4  ;;  %s1693_s21 = int_to_ptr.vmem [resolvable:$true] %s288_s21 }
   0xd   : > { %s1464_s24 = scalar_lea.hbm %s1973_s4, 256 }
   0xe   : > { %p1689_p7 = pnand %p1347_p6, %p1669_p1  ;;  %p1465_p8 = scmp.ne.s32.totalorder %s1973_s4, %s1464_s24 }
   0xf   : > { %p1471_p12 = scmp.lt.u32.totalorder %s1464_s24, %s1973_s4 }
  0x10   : > { %p1466_p9 = pneg %p1689_p7 }
  0x12   : > { %p1467_p10 = pnand %p1466_p9, %p1465_p8 }
  0x14   : > { %p1468_p11 = pneg %p1467_p10 }
  0x16   : > { %p1473_p13 = pnand %p1471_p12, %p1468_p11 }
  0x18   : > { %1476 = shalt.err (!%p1473_p13)
}
  0x19   : > { %s1477_s29 = scalar_lea.vmem %s276_s18, 256  ;;  %p1485_p6 = scmp.lt.s32.totalorder %s276_s18, %s276_s18 }
  0x1a   : > { %p1478_p0 = scmp.ne.s32.totalorder %s276_s18, %s1477_s29  ;;  %p1486_p1 = scmp.lt.s32.totalorder %s1477_s29, %s1477_s29 }
  0x1c   : > { %p1480_p2 = pnand %p1478_p0, %p1466_p9  ;;  %p1487_p4 = por %p1486_p1, %p1485_p6 }
  0x1e   : > { %p1481_p3 = pneg %p1480_p2 }
  0x20   : > { %p1488_p5 = pnand %p1487_p4, %p1481_p3 }
  0x22   : > { %1491 = shalt.err (!%p1488_p5)
}
  0x23   : > { %s1592_s30 = smov 64   ;;  %s1593_s17 = smov 4  }
  0x24   : > { %1350 = dma.hbm_to_vmem [thread:$0]  (!%p1689_p7), %s1973_s4, 256, %s276_s18, [#allocation5], %s1592_s30, %s1592_s30, %s1593_s17  }
  0x25   : > { %s1492_s25 = scalar_lea.hbm %s1974_s5, 256 }
  0x26   : > { %p1493_p8 = scmp.ne.s32.totalorder %s1974_s5, %s1492_s25  ;;  %p1499_p5 = scmp.lt.u32.totalorder %s1492_s25, %s1974_s5 }
  0x28   : > { %p1495_p1 = pnand %p1493_p8, %p1466_p9 }
  0x2a   : > { %p1496_p4 = pneg %p1495_p1 }
  0x2c   : > { %p1501_p10 = pnand %p1499_p5, %p1496_p4 }
  0x2e   : > { %1504 = shalt.err (!%p1501_p10)
}
  0x2f   : > { %s1505_s18 = scalar_lea.vmem %s1693_s21, 256  ;;  %p1513_p0 = scmp.lt.s32.totalorder %s1693_s21, %s1693_s21 }
  0x30   : > { %p1506_p11 = scmp.ne.s32.totalorder %s1693_s21, %s1505_s18  ;;  %p1514_p2 = scmp.lt.s32.totalorder %s1505_s18, %s1505_s18 }
  0x32   : > { %p1508_p12 = pnand %p1506_p11, %p1466_p9  ;;  %p1515_p3 = por %p1514_p2, %p1513_p0 }
  0x34   : > { %p1509_p13 = pneg %p1508_p12 }
  0x36   : > { %p1516_p6 = pnand %p1515_p3, %p1509_p13 }
  0x38   : > { %1519 = shalt.err (!%p1516_p6)
}
  0x39   : > { %1353 = dma.hbm_to_vmem [thread:$0]  (!%p1689_p7), %s1974_s5, 256, %s1693_s21, [#allocation5], %s1592_s30, %s1592_s30, %s1593_s17  }
  0x3a   : > { %s1743_s23 = sadd.s32 1, %s1588_s12   ;;  %s31_s24 = sadd.s32 1, %s1584_s11 }
  0x3b   : > { %s28_s19 = ssub.s32 %s1588_s12, %s1743_s23  ;;  %p38_p9 = scmp.ne.s32.totalorder %s1584_s11, %s1580_s10 }
  0x3c   : > { %p29_p8 = scmp.eq.s32.totalorder %s28_s19, 0  ;;  %p39_p1 = scmp.eq.s32.totalorder %s1588_s12, 0 }
  0x3d   : > { %p1360_p4 = scmp.lt.s32.totalorder %s1588_s12, 2  ;;  %s308_s25 = sand.u32 1, %s1584_s11  }
  0x3e   : > { %s1754_s26 = scalar_select %p29_p8, %s1584_s11, %s31_s24  }
  0x3f   : > { %p40_p5 = por %p39_p1, %p38_p9  ;;  %s1245_s27 = sshll.u32 %s308_s25, 5 }
  0x40   : > { %s1280_s28 = sshll.u32 %s1588_s12, 9  ;;  %s312_s21 = scalar_lea.vmem [#allocation2], %s1245_s27 }
  0x41   : > { %s1760_s20 = scalar_lea.hbm %s1969_s0, %s1280_s28  ;;  %s319_s30 = sshll.u32 %s312_s21, 4  ;;  %s1766_s30 = int_to_ptr.vmem [resolvable:$true] %s319_s30 }
  0x42   : > { %p1762_p7 = pnand %p1360_p4, %p40_p5  ;;  %s1768_s22 = scalar_lea.sflag [#allocation3], %s308_s25 }
  0x43   : > { %s1520_s24 = scalar_lea.hbm %s1760_s20, 512  ;;  %s1525_s28 = scalar_lea.hbm %s1969_s0, 1024 }
  0x44   : > { %p1521_p10 = scmp.ne.s32.totalorder %s1760_s20, %s1520_s24  ;;  %p1522_p11 = pneg %p1762_p7 }
  0x45   : > { %p1526_p0 = scmp.lt.u32.totalorder %s1760_s20, %s1969_s0  ;;  %p1527_p2 = scmp.lt.u32.totalorder %s1525_s28, %s1520_s24 }
  0x46   : > { %p1523_p12 = pnand %p1522_p11, %p1521_p10  ;;  %p1529_p6 = scmp.lt.u32.totalorder %s1520_s24, %s1760_s20 }
  0x47   : > { %p1528_p3 = por %p1527_p2, %p1526_p0 }
  0x48   : > { %p1524_p13 = pneg %p1523_p12 }
  0x49   : > { %p1530_p9 = por %p1529_p6, %p1528_p3 }
  0x4b   : > { %p1531_p8 = pnand %p1530_p9, %p1524_p13 }
  0x4d   : > { %1534 = shalt.err (!%p1531_p8)
}
  0x4e   : > { %s1535_s25 = scalar_lea.vmem %s1766_s30, 512  ;;  %s1594_s21 = smov [#allocation2]  }
  0x4f   : > { %p1536_p1 = scmp.ne.s32.totalorder %s1766_s30, %s1535_s25  ;;  %s1540_s19 = sshll.u32 %s1594_s21, 4  ;;  %s1541_s19 = int_to_ptr.vmem [resolvable:$false] %s1540_s19 }
  0x50   : > { %s1542_s27 = scalar_lea.vmem %s1541_s19, 1024  ;;  %p1543_p10 = scmp.lt.s32.totalorder %s1766_s30, %s1541_s19 }
  0x51   : > { %p1538_p4 = pnand %p1536_p1, %p1522_p11  ;;  %p1544_p12 = scmp.lt.s32.totalorder %s1542_s27, %s1535_s25 }
  0x53   : > { %p1539_p5 = pneg %p1538_p4  ;;  %p1545_p0 = por %p1544_p12, %p1543_p10 }
  0x55   : > { %p1546_p2 = pnand %p1545_p0, %p1539_p5 }
  0x57   : > { %1549 = shalt.err (!%p1546_p2)
}
  0x58   : > { %s1595_s24 = smov 128   ;;  %s1596_s28 = smov 8  }
  0x59   : > { %1357 = dma.hbm_to_vmem [thread:$0]  (!%p1762_p7), %s1760_s20, 512, %s1766_s30, %s1768_s22, %s1595_s24, %s1595_s24, %s1596_s28  }
  0x5a   : > { %p1988_p11 = scmp.ne.s32.totalorder %s1985_s16, 0 }
  0x5b   : > { %s333_s29 = sand.u32 (!%p1988_p11), 1, %s1580_s10   ;;  %p1989_p13 = scmp.ne.s32.totalorder (!%p1988_p11), %s1984_s15, 0 }
  0x5c   : > { %331 = sbr.rel (%p1988_p11) target bundleno = 1856 (0x740), region = 52  ;;  %s1249_s18 = sshll.u32 (!%p1988_p11), %s333_s29, 5 }
  0x5d   : > { %s334_s21 = scalar_lea.sflag (!%p1988_p11), [#allocation3], %s333_s29  ;;  %s337_s25 = scalar_lea.vmem (!%p1988_p11), [#allocation2], %s1249_s18 }
  0x63   : > { %1567 = dma.done.wait (%p1989_p13), %s334_s21, 512  }
  0x64   : > { %1569 = vsyncadd (%p1989_p13), %s334_s21, 4294966784  ;;  %p1990_p3 = scmp.ne.s32.totalorder %s1983_s14, 0 }
  0x66   : > { %1571 = dma.done.wait (%p1990_p3), [#allocation5], 512  }
  0x67   : > { %1573 = vsyncadd (%p1990_p3), [#allocation5], 4294966784  ;;  %vm409_vm0 = vcmask 261120   ;;  %v403_v0 = vld [vmem:[%s337_s25] sm:$0xff]  ;;  %v405_v1 = vld [vmem:[%s337_s25 + $0x10] sm:$0xff]  ;;  %vm760_vm1 = vcmask 130048  }
  0x68   : > { %v404_v2 = vld [vmem:[%s337_s25 + $0x8] sm:$0xff]  ;;  %v410_v3 = vsel %vm409_vm0, %v403_v0, 0.0  ;;  %v416_v4 = vsel %vm409_vm0, %v405_v1, 0.0  ;;  %v406_v5 = vld [vmem:[%s337_s25 + $0x18] sm:$0xff]  ;;  %v1402_v28 = vld [vmem:[%s1972_s3] sm:$0xff]   ;;  %vm770_vm2 = vcmask 128000  }
  0x69   : > { %411 = vadd.xlane.f32.xlu0 %v410_v3  ;;  %417 = vadd.xlane.f32.xlu1 %v416_v4  ;;  %v413_v6 = vsel %vm409_vm0, %v404_v2, 0.0  ;;  %v419_v7 = vsel %vm409_vm0, %v406_v5, 0.0  ;;  %v1403_v29 = vld [vmem:[#allocation6] sm:$0xff]   ;;  %v1404_v30 = vld [vmem:[%s1972_s3 + $0x8] sm:$0xff]   ;;  %v1405_v31 = vld [vmem:[#allocation6 + $0x8] sm:$0xff]   ;;  %s1252_s27 = sshll.u32 %s1239_s13, 1 }
  0x6a   : > { %1301 = vmatprep.subr.bf16.mxu0 %v1402_v28  ;;  %1309 = vmatprep.subr.bf16.mxu1 %v1403_v29  ;;  %v1406_v32 = vld [vmem:[#allocation4] sm:$0xff]   ;;  %p389_p7 = scmp.lt.s32.totalorder %s1252_s27, 3  ;;  %vm983_vm3 = vcmask 259072  }
  0x6b   : > { %1302 = vmatpush3.bf16.msra.mxu0 %v1402_v28  ;;  %1310 = vmatpush3.bf16.msra.mxu1 %v1403_v29  ;;  %v1258_v47 = vld [vmem:[%s1970_s1] ss:$0 sm:$0xff] }
  0x6c   : > { %1303 = vmatprep.subr.bf16.mxu0 %v1404_v30  ;;  %1311 = vmatprep.subr.bf16.mxu1 %v1405_v31  ;;  %v1259_v53 = vld [vmem:[%s1971_s2] ss:$0 sm:$0xff]  ;;  %s1996_s27 = smov (!%p389_p7, %s1252_s27), 3 }
  0x6d   : > { %414 = vadd.xlane.f32.xlu0 %v413_v6  ;;  %420 = vadd.xlane.f32.xlu1 %v419_v7  ;;  %s1281_s24 = sshll.u32 %s1996_s27, 5 }
  0x6e   : > { %s393_s28 = scalar_lea.vmem %s1977_s8, %s1281_s24  ;;  %s1932_s16 = scalar_lea.vmem %s1978_s9, %s1281_s24 }
  0x6f   : > { %1304 = vmatpush3.bf16.msra.mxu0 %v1404_v30  ;;  %1312 = vmatpush3.bf16.msra.mxu1 %v1405_v31 }
  0x70   : > { %1317 = vmatprep.subr.bf16.mxu0 %v1406_v32 }
  0xf6   : > { %v412_v8 = vpop.xlane.xlu0 %411  ;;  %v418_v9 = vpop.xlane.xlu1 %417 }
  0xf7   : > { %v423_v10 = vmul.f32 0.03125, %v412_v8  ;;  %v425_v11 = vmul.f32 0.03125, %v418_v9 }
  0xf9   : > { %v427_v12 = vsub.f32 %v403_v0, %v423_v10  ;;  %v429_v13 = vsub.f32 %v405_v1, %v425_v11  ;;  %v1407_v1 = vld [vmem:[#allocation4 + $0x8] sm:$0xff]  }
  0xfa   : > { %v415_v14 = vpop.xlane.xlu0 %414  ;;  %v421_v15 = vpop.xlane.xlu1 %420 }
  0xfb   : > { %v424_v16 = vmul.f32 0.03125, %v415_v14  ;;  %v426_v17 = vmul.f32 0.03125, %v421_v15  ;;  %v431_v18 = vmul.f32 %v427_v12, %v427_v12  ;;  %v433_v19 = vmul.f32 %v429_v13, %v429_v13 }
  0xfd   : > { %v428_v20 = vsub.f32 %v404_v2, %v424_v16  ;;  %v430_v21 = vsub.f32 %v406_v5, %v426_v17  ;;  %v435_v22 = vsel %vm409_vm0, %v431_v18, 0.0  ;;  %v441_v23 = vsel %vm409_vm0, %v433_v19, 0.0 }
  0xfe   : > { %436 = vadd.xlane.f32.xlu0 %v435_v22 }
  0xff   : > { %v432_v24 = vmul.f32 %v428_v20, %v428_v20  ;;  %v434_v25 = vmul.f32 %v430_v21, %v430_v21 }
 0x101   : > { %v438_v26 = vsel %vm409_vm0, %v432_v24, 0.0  ;;  %v444_v27 = vsel %vm409_vm0, %v434_v25, 0.0 }
 0x102   : > { %442 = vadd.xlane.f32.xlu0 %v441_v23  ;;  %439 = vadd.xlane.f32.xlu1 %v438_v26 }
 0x106   : > { %445 = vadd.xlane.f32.xlu1 %v444_v27 }
 0x18b   : > { %v437_v33 = vpop.xlane.xlu0 %436 }
 0x18c   : > { %v447_v34 = vmul.f32 0.03125, %v437_v33 }
 0x18e   : > { %v451_v35 = vadd.f32 1e-05, %v447_v34 }
 0x18f   : > { %v440_v36 = vpop.xlane.xlu1 %439  ;;  %v443_v37 = vpop.xlane.xlu0 %442 }
 0x190   : > { %1408 = vrsqrt.f32 %v451_v35  ;;  %v448_v38 = vmul.f32 0.03125, %v440_v36  ;;  %v449_v39 = vmul.f32 0.03125, %v443_v37 }
 0x192   : > { %v452_v40 = vadd.f32 1e-05, %v448_v38  ;;  %v453_v41 = vadd.f32 1e-05, %v449_v39 }
 0x193   : > { %v446_v42 = vpop.xlane.xlu1 %445 }
 0x194   : > { %1410 = vrsqrt.f32 %v452_v40  ;;  %v450_v43 = vmul.f32 0.03125, %v446_v42 }
 0x195   : > { %1412 = vrsqrt.f32 %v453_v41 }
 0x196   : > { %v454_v44 = vadd.f32 1e-05, %v450_v43 }
 0x198   : > { %1414 = vrsqrt.f32 %v454_v44 }
 0x19a   : > { %v1409_v45 = vpop.eup %1408 }
 0x19b   : > { %v459_v46 = vmul.f32 %v1409_v45, %v427_v12 }
 0x19d   : > { %v469_v51 = vmul.f32 %v1258_v47, %v459_v46 }
 0x19e   : > { %v1411_v48 = vpop.eup %1410 }
 0x19f   : > { %v1413_v49 = vpop.eup %1412  ;;  %v460_v50 = vmul.f32 %v1411_v48, %v428_v20  ;;  %v479_v57 = vadd.f32 %v1259_v53, %v469_v51 }
 0x1a0   : > { %v461_v52 = vmul.f32 %v1413_v49, %v429_v13 }
 0x1a1   : > { %v470_v54 = vmul.f32 %v1258_v47, %v460_v50 }
 0x1a2   : > { %v1415_v55 = vpop.eup %1414  ;;  %v471_v59 = vmul.f32 %v1258_v47, %v461_v52 }
 0x1a3   : > { %v462_v56 = vmul.f32 %v1415_v55, %v430_v21  ;;  %v480_v58 = vadd.f32 %v1259_v53, %v470_v54 }
 0x1a4   : > { %v481_v62 = vadd.f32 %v1259_v53, %v471_v59 }
 0x1a5   : > { %v483_v60 = vpack.c.bf16 %v480_v58, %v479_v57  ;;  %v472_v61 = vmul.f32 %v1258_v47, %v462_v56 }
 0x1a7   : > { %1305 = vmatprep.mubr.msk.bf16.mxu0 %vm409_vm0, %v483_v60  ;;  %1313 = vmatprep.mubr.msk.bf16.mxu1 %vm409_vm0, %v483_v60  ;;  %v482_v63 = vadd.f32 %v1259_v53, %v472_v61 }
 0x1a9   : > { %v484_v0 = vpack.c.bf16 %v482_v63, %v481_v62 }
 0x1ab   : > { %1306 = vmatmul.mubr.msk.bf16.vlgmr.msra.gmra.mrb[0].mxu0 %vm409_vm0, %v484_v0  ;;  %1314 = vmatmul.mubr.msk.bf16.vlgmr.msra.gmra.mrb[0].mxu1 %vm409_vm0, %v484_v0 }
 0x1ac   : > { %1318 = vmatpush3.bf16.msra.mxu0 %v1406_v32 }
 0x1ad   : > { %1319 = vmatprep.subr.bf16.mxu0 %v1407_v1 }
 0x1b0   : > { %1320 = vmatpush3.bf16.msra.mxu0 %v1407_v1 }
 0x27e   : > { %v1307_v2 = vpop.f32.mrb[0].mxu0  ;;  %v1315_v3 = vpop.f32.mrb[0].mxu1 }
 0x27f   : > { %v541_v4 = vpop.f32.mrb[1].mxu0  ;;  %v608_v5 = vpop.f32.mrb[1].mxu1 }
 0x280   : > { %v1308_v6 = vpop.f32.mrb[2].mxu0  ;;  %v1316_v7 = vpop.f32.mrb[2].mxu1 }
 0x281   : > { %v557_v8 = vpack.c.bf16 %v1308_v6, %v1307_v2  ;;  %v624_v9 = vpack.c.bf16 %v1316_v7, %v1315_v3  ;;  %v544_v10 = vpop.f32.mrb[3].mxu0  ;;  %v611_v11 = vpop.f32.mrb[3].mxu1 }
 0x282   : > { %v556_v12 = vpack.c.bf16 %v544_v10, %v541_v4  ;;  %v623_v13 = vpack.c.bf16 %v611_v11, %v608_v5 }
 0x283   : > { %1331 = vmatprep.subr.bf16.mxu0 %v624_v9 }
 0x284   : > { %1321 = vmatprep.mubr.msk.bf16.mxu0 %vm409_vm0, %v556_v12  ;;  %1325 = vmatprep.subr.bf16.mxu1 %v623_v13 }
 0x285   : > { %1322 = vmatmul.mubr.msk.bf16.vlgmr.msra.gmra.mrb[4].mxu0 %vm409_vm0, %v557_v8  ;;  %1326 = vmatpush3.bf16.msra.mxu1 %v623_v13 }
 0x286   : > { %1332 = vmatpush3.bf16.msra.mxu0 %v624_v9 }
 0x358   : > { %v1323_v14 = vpop.f32.mrb[4].mxu0 }
 0x359   : > { %728 = vxpose.xlu1.b32.start [1/2] (short) (narrow) %v1323_v14, 32  ;;  %v681_v15 = vpop.f32.mrb[5].mxu0 }
 0x35a   : > { %696 = vxpose.xlu0.b32.start [1/2] (short) (narrow) %v681_v15, 32  ;;  %v1324_v16 = vpop.f32.mrb[6].mxu0 }
 0x35b   : > { %v684_v17 = vpop.f32.mrb[7].mxu0 }
 0x35d   : > { %729 = vxpose.xlu1.b32.end [2/2] (short) (narrow) %v1324_v16, 32 }
 0x35e   : > { %697 = vxpose.xlu0.b32.end [2/2] (short) (narrow) %v684_v17, 32 }
 0x3d9   : > { %v744_v18 = vpop.trf.xlu1 }
 0x3da   : > { %v712_v19 = vpop.trf.xlu0  ;;  %v774_v20 = vsel %vm760_vm1, %v744_v18, -inf }
 0x3db   : > { %775 = vmax.xlane.f32.xlu0 %v774_v20  ;;  %v761_v24 = vsel %vm760_vm1, %v712_v19, -inf }
 0x3dd   : > { %v745_v21 = vpop.trf.xlu1 }
 0x3de   : > { %v713_v22 = vpop.trf.xlu0  ;;  %v777_v23 = vsel %vm760_vm1, %v745_v21, -inf }
 0x3df   : > { %778 = vmax.xlane.f32.xlu1 %v777_v23  ;;  %762 = vmax.xlane.f32.xlu0 %v761_v24  ;;  %v764_v27 = vsel %vm760_vm1, %v713_v22, -inf }
 0x3e1   : > { %v746_v25 = vpop.trf.xlu1 }
 0x3e2   : > { %v714_v26 = vpop.trf.xlu0  ;;  %v780_v29 = vsel %vm760_vm1, %v746_v25, -inf }
 0x3e3   : > { %765 = vmax.xlane.f32.xlu1 %v764_v27  ;;  %v767_v28 = vsel %vm760_vm1, %v714_v26, -inf }
 0x3e4   : > { %768 = vmax.xlane.f32.xlu0 %v767_v28 }
 0x3e5   : > { %v747_v31 = vpop.trf.xlu1 }
 0x3e6   : > { %v715_v30 = vpop.trf.xlu0  ;;  %v783_v33 = vsel %vm770_vm2, %v747_v31, -inf }
 0x3e7   : > { %v771_v32 = vsel %vm770_vm2, %v715_v30, -inf }
 0x3e8   : > { %781 = vmax.xlane.f32.xlu0 %v780_v29  ;;  %772 = vmax.xlane.f32.xlu1 %v771_v32 }
 0x3ec   : > { %784 = vmax.xlane.f32.xlu1 %v783_v33 }
 0x468   : > { %v776_v34 = vpop.xlane.xlu0 %775 }
 0x469   : > { %v790_v35 = vsub.f32 %v744_v18, %v776_v34 }
 0x46b   : > { %v802_v36 = vmul.f32 1.442695, %v790_v35 }
 0x46c   : > { %v779_v37 = vpop.xlane.xlu1 %778  ;;  %v763_v38 = vpop.xlane.xlu0 %762 }
 0x46d   : > { %1416 = vpow2.f32 %v802_v36  ;;  %v791_v39 = vsub.f32 %v745_v21, %v779_v37  ;;  %v786_v40 = vsub.f32 %v712_v19, %v763_v38 }
 0x46f   : > { %v804_v41 = vmul.f32 1.442695, %v791_v39  ;;  %v794_v42 = vmul.f32 1.442695, %v786_v40 }
 0x470   : > { %v766_v43 = vpop.xlane.xlu1 %765 }
 0x471   : > { %1418 = vpow2.f32 %v804_v41  ;;  %v787_v44 = vsub.f32 %v713_v22, %v766_v43  ;;  %v769_v45 = vpop.xlane.xlu0 %768 }
 0x472   : > { %1420 = vpow2.f32 %v794_v42  ;;  %v788_v46 = vsub.f32 %v714_v26, %v769_v45 }
 0x473   : > { %v796_v47 = vmul.f32 1.442695, %v787_v44 }
 0x474   : > { %v798_v48 = vmul.f32 1.442695, %v788_v46 }
 0x475   : > { %1422 = vpow2.f32 %v796_v47  ;;  %v773_v49 = vpop.xlane.xlu1 %772  ;;  %v782_v50 = vpop.xlane.xlu0 %781 }
 0x476   : > { %1424 = vpow2.f32 %v798_v48  ;;  %v789_v51 = vsub.f32 %v715_v30, %v773_v49  ;;  %v792_v52 = vsub.f32 %v746_v25, %v782_v50 }
 0x477   : > { %v1417_v53 = vpop.eup %1416 }
 0x478   : > { %v800_v54 = vmul.f32 1.442695, %v789_v51  ;;  %v806_v55 = vmul.f32 1.442695, %v792_v52  ;;  %v822_v56 = vsel %vm760_vm1, %v1417_v53, 0.0 }
 0x479   : > { %v785_v57 = vpop.xlane.xlu1 %784  ;;  %823 = vadd.xlane.f32.xlu0 %v822_v56 }
 0x47a   : > { %1426 = vpow2.f32 %v800_v54  ;;  %v793_v58 = vsub.f32 %v747_v31, %v785_v57 }
 0x47b   : > { %v1419_v59 = vpop.eup %1418  ;;  %1428 = vpow2.f32 %v806_v55 }
 0x47c   : > { %v1421_v60 = vpop.eup %1420  ;;  %v808_v61 = vmul.f32 1.442695, %v793_v58  ;;  %v825_v62 = vsel %vm760_vm1, %v1419_v59, 0.0 }
 0x47d   : > { %826 = vadd.xlane.f32.xlu1 %v825_v62  ;;  %v810_v63 = vsel %vm760_vm1, %v1421_v60, 0.0 }
 0x47e   : > { %1430 = vpow2.f32 %v808_v61  ;;  %811 = vadd.xlane.f32.xlu0 %v810_v63 }
 0x47f   : > { %v1423_v0 = vpop.eup %1422 }
 0x480   : > { %v1425_v1 = vpop.eup %1424  ;;  %v813_v2 = vsel %vm760_vm1, %v1423_v0, 0.0 }
 0x481   : > { %814 = vadd.xlane.f32.xlu1 %v813_v2  ;;  %v816_v3 = vsel %vm760_vm1, %v1425_v1, 0.0 }
 0x482   : > { %817 = vadd.xlane.f32.xlu0 %v816_v3 }
 0x484   : > { %v1427_v4 = vpop.eup %1426 }
 0x485   : > { %v1429_v5 = vpop.eup %1428  ;;  %v819_v6 = vsel %vm770_vm2, %v1427_v4, 0.0 }
 0x486   : > { %820 = vadd.xlane.f32.xlu1 %v819_v6  ;;  %v828_v7 = vsel %vm760_vm1, %v1429_v5, 0.0 }
 0x487   : > { %829 = vadd.xlane.f32.xlu0 %v828_v7 }
 0x488   : > { %v1431_v8 = vpop.eup %1430 }
 0x489   : > { %v831_v9 = vsel %vm770_vm2, %v1431_v8, 0.0 }
 0x48a   : > { %832 = vadd.xlane.f32.xlu1 %v831_v9 }
 0x506   : > { %v824_v10 = vpop.xlane.xlu0 %823 }
 0x507   : > { %1432 = vrcp.f32 %v824_v10 }
 0x50a   : > { %v827_v11 = vpop.xlane.xlu1 %826 }
 0x50b   : > { %1434 = vrcp.f32 %v827_v11  ;;  %v812_v12 = vpop.xlane.xlu0 %811 }
 0x50c   : > { %1436 = vrcp.f32 %v812_v12 }
 0x50e   : > { %v815_v13 = vpop.xlane.xlu1 %814 }
 0x50f   : > { %1438 = vrcp.f32 %v815_v13  ;;  %v818_v14 = vpop.xlane.xlu0 %817 }
 0x510   : > { %1440 = vrcp.f32 %v818_v14 }
 0x511   : > { %v1433_v15 = vpop.eup %1432 }
 0x512   : > { %v843_v20 = vmul.f32 %v1433_v15, %v1417_v53 }
 0x513   : > { %v821_v16 = vpop.xlane.xlu1 %820 }
 0x514   : > { %1442 = vrcp.f32 %v821_v16  ;;  %v830_v17 = vpop.xlane.xlu0 %829  ;;  %854 = vst.msk [vmem:[%s393_s28 + $0x20] sm:$0xff] %vm760_vm1, %v843_v20 }
 0x515   : > { %v1435_v18 = vpop.eup %1434  ;;  %1444 = vrcp.f32 %v830_v17 }
 0x516   : > { %v1437_v19 = vpop.eup %1436  ;;  %v845_v21 = vmul.f32 %v1435_v18, %v1419_v59 }
 0x517   : > { %v833_v22 = vpop.xlane.xlu1 %832  ;;  %v835_v23 = vmul.f32 %v1437_v19, %v1421_v60 }
 0x518   : > { %1446 = vrcp.f32 %v833_v22  ;;  %v860_v24 = vpack.c.bf16 %v845_v21, %v843_v20  ;;  %855 = vst.msk [vmem:[%s393_s28 + $0x28] sm:$0xff] %vm760_vm1, %v845_v21 }
 0x519   : > { %v1439_v25 = vpop.eup %1438  ;;  %850 = vst.msk [vmem:[%s393_s28] sm:$0xff] %vm760_vm1, %v835_v23 }
 0x51a   : > { %v1441_v26 = vpop.eup %1440  ;;  %1333 = vmatprep.mubr.msk.bf16.mxu0 %vm760_vm1, %v860_v24  ;;  %v837_v27 = vmul.f32 %v1439_v25, %v1423_v0 }
 0x51b   : > { %v839_v28 = vmul.f32 %v1441_v26, %v1425_v1 }
 0x51c   : > { %851 = vst.msk [vmem:[%s393_s28 + $0x8] sm:$0xff] %vm760_vm1, %v837_v27  ;;  %v858_v29 = vpack.c.bf16 %v837_v27, %v835_v23 }
 0x51d   : > { %852 = vst.msk [vmem:[%s393_s28 + $0x10] sm:$0xff] %vm760_vm1, %v839_v28 }
 0x51e   : > { %v1443_v30 = vpop.eup %1442  ;;  %1327 = vmatprep.mubr.msk.bf16.mxu1 %vm760_vm1, %v858_v29 }
 0x51f   : > { %v1445_v31 = vpop.eup %1444  ;;  %v841_v32 = vmul.f32 %v1443_v30, %v1427_v4 }
 0x520   : > { %v847_v33 = vmul.f32 %v1445_v31, %v1429_v5 }
 0x521   : > { %853 = vst.msk [vmem:[%s393_s28 + $0x18] sm:$0x3f] %vm770_vm2, %v841_v32  ;;  %v859_v34 = vpack.c.bf16 %v841_v32, %v839_v28 }
 0x522   : > { %v1447_v35 = vpop.eup %1446  ;;  %856 = vst.msk [vmem:[%s393_s28 + $0x30] sm:$0xff] %vm760_vm1, %v847_v33 }
 0x523   : > { %v849_v36 = vmul.f32 %v1447_v35, %v1431_v8  ;;  %1328 = vmatmul.mubr.msk.bf16.vlgmr.msra.gmra.mrb[4].mxu1 %vm760_vm1, %v859_v34 }
 0x525   : > { %857 = vst.msk [vmem:[%s393_s28 + $0x38] sm:$0x3f] %vm770_vm2, %v849_v36  ;;  %v861_v37 = vpack.c.bf16 %v849_v36, %v847_v33 }
 0x527   : > { %1334 = vmatmul.mubr.msk.bf16.vlgmr.msra.gmra.mrb[8].mxu0 %vm760_vm1, %v861_v37 }
 0x5f6   : > { %v1329_v38 = vpop.f32.mrb[4].mxu1 }
 0x5f7   : > { %v902_v39 = vpop.f32.mrb[5].mxu1  ;;  %v980_v40 = vsel %vm409_vm0, %v1329_v38, 0.0 }
 0x5f8   : > { %981 = vadd.xlane.f32.xlu0 %v980_v40  ;;  %v1330_v41 = vpop.f32.mrb[6].mxu1  ;;  %v974_v50 = vsel %vm409_vm0, %v902_v39, 0.0 }
 0x5f9   : > { %v905_v42 = vpop.f32.mrb[7].mxu1  ;;  %v984_v43 = vsel %vm983_vm3, %v1330_v41, 0.0 }
 0x5fa   : > { %985 = vadd.xlane.f32.xlu1 %v984_v43  ;;  %v1335_v44 = vpop.f32.mrb[8].mxu0  ;;  %v977_v51 = vsel %vm409_vm0, %v905_v42, 0.0 }
 0x5fb   : > { %v957_v45 = vpop.f32.mrb[9].mxu0  ;;  %v993_v52 = vsel %vm409_vm0, %v1335_v44, 0.0 }
 0x5fc   : > { %v1336_v46 = vpop.f32.mrb[10].mxu0  ;;  %v987_v47 = vsel %vm409_vm0, %v957_v45, 0.0 }
 0x5fd   : > { %988 = vadd.xlane.f32.xlu0 %v987_v47  ;;  %v960_v48 = vpop.f32.mrb[11].mxu0  ;;  %v996_v53 = vsel %vm983_vm3, %v1336_v46, 0.0 }
 0x5fe   : > { %v990_v49 = vsel %vm409_vm0, %v960_v48, 0.0 }
 0x5ff   : > { %991 = vadd.xlane.f32.xlu1 %v990_v49 }
 0x601   : > { %975 = vadd.xlane.f32.xlu0 %v974_v50 }
 0x603   : > { %978 = vadd.xlane.f32.xlu1 %v977_v51  ;;  %v1276_v51 = vld [vmem:[%s1975_s6] ss:$0 sm:$0xff] }
 0x605   : > { %994 = vadd.xlane.f32.xlu0 %v993_v52 }
 0x607   : > { %997 = vadd.xlane.f32.xlu1 %v996_v53 }
 0x685   : > { %v982_v54 = vpop.xlane.xlu0 %981 }
 0x686   : > { %v1001_v55 = vmul.f32 0.03125, %v982_v54 }
 0x687   : > { %v986_v56 = vpop.xlane.xlu1 %985 }
 0x688   : > { %v1879_v57 = vsub.f32 %v1329_v38, %v1001_v55  ;;  %v1002_v58 = vmul.f32 0.03125, %v986_v56 }
 0x68a   : > { %v1881_v59 = vsub.f32 %v1330_v41, %v1002_v58  ;;  %v989_v60 = vpop.xlane.xlu0 %988  ;;  %v1017_v61 = vmul.f32 %v1879_v57, %v1879_v57  ;;  %v1277_v58 = vld [vmem:[%s1976_s7] ss:$0 sm:$0xff] }
 0x68b   : > { %v1003_v62 = vmul.f32 0.03125, %v989_v60 }
 0x68c   : > { %v992_v63 = vpop.xlane.xlu1 %991  ;;  %v1029_v0 = vsel %vm409_vm0, %v1017_v61, 0.0  ;;  %v1018_v1 = vmul.f32 %v1881_v59, %v1881_v59 }
 0x68d   : > { %v1888_v2 = vsub.f32 %v957_v45, %v1003_v62  ;;  %v1004_v3 = vmul.f32 0.03125, %v992_v63  ;;  %1030 = vadd.xlane.f32.xlu0 %v1029_v0 }
 0x68e   : > { %v976_v4 = vpop.xlane.xlu0 %975  ;;  %v1032_v5 = vsel %vm983_vm3, %v1018_v1, 0.0 }
 0x68f   : > { %v1891_v6 = vsub.f32 %v960_v48, %v1004_v3  ;;  %v999_v7 = vmul.f32 0.03125, %v976_v4  ;;  %1033 = vadd.xlane.f32.xlu1 %v1032_v5  ;;  %v1019_v8 = vmul.f32 %v1888_v2, %v1888_v2 }
 0x690   : > { %v979_v9 = vpop.xlane.xlu1 %978 }
 0x691   : > { %v1895_v10 = vsub.f32 %v902_v39, %v999_v7  ;;  %v1000_v11 = vmul.f32 0.03125, %v979_v9  ;;  %v1035_v12 = vsel %vm409_vm0, %v1019_v8, 0.0  ;;  %v1020_v13 = vmul.f32 %v1891_v6, %v1891_v6 }
 0x692   : > { %1036 = vadd.xlane.f32.xlu0 %v1035_v12  ;;  %v995_v14 = vpop.xlane.xlu0 %994 }
 0x693   : > { %v1900_v15 = vsub.f32 %v905_v42, %v1000_v11  ;;  %v1005_v16 = vmul.f32 0.03125, %v995_v14  ;;  %v1038_v17 = vsel %vm409_vm0, %v1020_v13, 0.0  ;;  %v1015_v18 = vmul.f32 %v1895_v10, %v1895_v10 }
 0x694   : > { %1039 = vadd.xlane.f32.xlu1 %v1038_v17  ;;  %v998_v19 = vpop.xlane.xlu1 %997 }
 0x695   : > { %v1905_v20 = vsub.f32 %v1335_v44, %v1005_v16  ;;  %v1006_v21 = vmul.f32 0.03125, %v998_v19  ;;  %v1023_v22 = vsel %vm409_vm0, %v1015_v18, 0.0  ;;  %v1016_v23 = vmul.f32 %v1900_v15, %v1900_v15 }
 0x696   : > { %1024 = vadd.xlane.f32.xlu0 %v1023_v22 }
 0x697   : > { %v1910_v24 = vsub.f32 %v1336_v46, %v1006_v21  ;;  %v1026_v25 = vsel %vm409_vm0, %v1016_v23, 0.0  ;;  %v1021_v26 = vmul.f32 %v1905_v20, %v1905_v20 }
 0x698   : > { %1027 = vadd.xlane.f32.xlu1 %v1026_v25 }
 0x699   : > { %v1041_v27 = vsel %vm409_vm0, %v1021_v26, 0.0  ;;  %v1022_v28 = vmul.f32 %v1910_v24, %v1910_v24 }
 0x69a   : > { %1042 = vadd.xlane.f32.xlu0 %v1041_v27 }
 0x69b   : > { %v1044_v29 = vsel %vm983_vm3, %v1022_v28, 0.0 }
 0x69c   : > { %1045 = vadd.xlane.f32.xlu1 %v1044_v29 }
 0x71a   : > { %v1031_v30 = vpop.xlane.xlu0 %1030 }
 0x71b   : > { %v1049_v31 = vmul.f32 0.03125, %v1031_v30 }
 0x71c   : > { %v1034_v32 = vpop.xlane.xlu1 %1033 }
 0x71d   : > { %v1057_v33 = vadd.f32 1e-05, %v1049_v31  ;;  %v1050_v34 = vmul.f32 0.03125, %v1034_v32 }
 0x71f   : > { %1448 = vrsqrt.f32 %v1057_v33  ;;  %v1058_v35 = vadd.f32 1e-05, %v1050_v34  ;;  %v1037_v36 = vpop.xlane.xlu0 %1036 }
 0x720   : > { %v1051_v37 = vmul.f32 0.03125, %v1037_v36 }
 0x721   : > { %1450 = vrsqrt.f32 %v1058_v35  ;;  %v1040_v38 = vpop.xlane.xlu1 %1039 }
 0x722   : > { %v1059_v39 = vadd.f32 1e-05, %v1051_v37  ;;  %v1052_v40 = vmul.f32 0.03125, %v1040_v38 }
 0x723   : > { %v1025_v41 = vpop.xlane.xlu0 %1024 }
 0x724   : > { %1452 = vrsqrt.f32 %v1059_v39  ;;  %v1060_v42 = vadd.f32 1e-05, %v1052_v40  ;;  %v1047_v43 = vmul.f32 0.03125, %v1025_v41 }
 0x725   : > { %v1028_v44 = vpop.xlane.xlu1 %1027 }
 0x726   : > { %1454 = vrsqrt.f32 %v1060_v42  ;;  %v1055_v45 = vadd.f32 1e-05, %v1047_v43  ;;  %v1048_v46 = vmul.f32 0.03125, %v1028_v44 }
 0x727   : > { %v1043_v47 = vpop.xlane.xlu0 %1042 }
 0x728   : > { %1456 = vrsqrt.f32 %v1055_v45  ;;  %v1056_v48 = vadd.f32 1e-05, %v1048_v46  ;;  %v1053_v49 = vmul.f32 0.03125, %v1043_v47 }
 0x729   : > { %v1449_v50 = vpop.eup %1448  ;;  %v1046_v52 = vpop.xlane.xlu1 %1045 }
 0x72a   : > { %v1073_v53 = vmul.f32 %v1449_v50, %v1879_v57  ;;  %1458 = vrsqrt.f32 %v1056_v48  ;;  %v1061_v54 = vadd.f32 1e-05, %v1053_v49  ;;  %v1054_v55 = vmul.f32 0.03125, %v1046_v52 }
 0x72b   : > { %v1451_v56 = vpop.eup %1450 }
 0x72c   : > { %v1087_v60 = vmul.f32 %v1276_v51, %v1073_v53  ;;  %v1074_v61 = vmul.f32 %v1451_v56, %v1881_v59  ;;  %1460 = vrsqrt.f32 %v1061_v54  ;;  %v1062_v62 = vadd.f32 1e-05, %v1054_v55 }
 0x72e   : > { %v1453_v57 = vpop.eup %1452  ;;  %v1101_v63 = vadd.f32 %v1277_v58, %v1087_v60  ;;  %v1088_v0 = vmul.f32 %v1276_v51, %v1074_v61  ;;  %1462 = vrsqrt.f32 %v1062_v62 }
 0x72f   : > { %v1075_v59 = vmul.f32 %v1453_v57, %v1888_v2 }
 0x730   : > { %v1455_v1 = vpop.eup %1454  ;;  %1109 = vst.msk [vmem:[%s1932_s16 + $0x10] sm:$0xff] %vm409_vm0, %v1101_v63  ;;  %v1102_v3 = vadd.f32 %v1277_v58, %v1088_v0 }
 0x731   : > { %v1076_v5 = vmul.f32 %v1455_v1, %v1891_v6  ;;  %v1089_v9 = vmul.f32 %v1276_v51, %v1075_v59 }
 0x732   : > { %v1457_v4 = vpop.eup %1456  ;;  %1110 = vst.msk [vmem:[%s1932_s16 + $0x18] sm:$0x3f] %vm983_vm3, %v1102_v3 }
 0x733   : > { %v1071_v7 = vmul.f32 %v1457_v4, %v1895_v10  ;;  %v1090_v14 = vmul.f32 %v1276_v51, %v1076_v5  ;;  %v1103_v6 = vadd.f32 %v1277_v58, %v1089_v9 }
 0x734   : > { %v1459_v8 = vpop.eup %1458 }
 0x735   : > { %v1085_v11 = vmul.f32 %v1276_v51, %v1071_v7  ;;  %v1072_v12 = vmul.f32 %v1459_v8, %v1900_v15  ;;  %v1104_v22 = vadd.f32 %v1277_v58, %v1090_v14  ;;  %1111 = vst.msk [vmem:[%s1932_s16 + $0x20] sm:$0xff] %vm409_vm0, %v1103_v6 }
 0x736   : > { %v1461_v13 = vpop.eup %1460 }
 0x737   : > { %v1099_v2 = vadd.f32 %v1277_v58, %v1085_v11  ;;  %v1086_v16 = vmul.f32 %v1276_v51, %v1072_v12  ;;  %v1077_v17 = vmul.f32 %v1461_v13, %v1905_v20  ;;  %1112 = vst.msk [vmem:[%s1932_s16 + $0x28] sm:$0xff] %vm409_vm0, %v1104_v22 }
 0x738   : > { %v1463_v18 = vpop.eup %1462 }
 0x739   : > { %1107 = vst.msk [vmem:[%s1932_s16] sm:$0xff] %vm409_vm0, %v1099_v2  ;;  %v1100_v10 = vadd.f32 %v1277_v58, %v1086_v16  ;;  %v1091_v19 = vmul.f32 %v1276_v51, %v1077_v17  ;;  %v1078_v21 = vmul.f32 %v1463_v18, %v1910_v24 }
 0x73b   : > { %1108 = vst.msk [vmem:[%s1932_s16 + $0x8] sm:$0xff] %vm409_vm0, %v1100_v10  ;;  %v1105_v15 = vadd.f32 %v1277_v58, %v1091_v19  ;;  %v1092_v23 = vmul.f32 %v1276_v51, %v1078_v21 }
 0x73d   : > { %1113 = vst.msk [vmem:[%s1932_s16 + $0x30] sm:$0xff] %vm409_vm0, %v1105_v15  ;;  %v1106_v20 = vadd.f32 %v1277_v58, %v1092_v23 }
 0x73f   : > { %1114 = vst.msk [vmem:[%s1932_s16 + $0x38] sm:$0x3f] %vm983_vm3, %v1106_v20 }
 0x740 PF: > { %p21_p6 = scmp.ge.s32.totalorder %s1743_s23, 4   ;;  %s1991_s30 = smov %s1580_s10 }
 0x741   : > { %s1992_s10 = smov %s1584_s11  ;;  %s1993_s11 = smov %s1754_s26 }
 0x742   : > { %s1994_s12 = smov %s1743_s23  ;;  %23 = sbr.rel (!%p21_p6) target bundleno = 4 (0x4), region = 112 }
 0x749   :  { %1158 = vsyncpa [#allocation3], 1 }
 0x74a   :  { %1160 = vsyncpa [#allocation3 + $0x1], 1 }
 0x74b   :  { %1161 = vsyncpa [#allocation5], 1 }

</bundles_post_ra>
